<compile_context>
chip_gen: v7x
topology: tpu7x:2x2x1
jax: 0.10.0
libtpu: 0.0.40
codegen_flags: <defaults>
</compile_context>

<pallas_src>
import functools

import jax
import jax.numpy as jnp
from jax.experimental import pallas as pl
from jax.experimental.pallas import tpu as pltpu


def layernorm_kernel(x_ref, gamma_ref, beta_ref, o_ref, *, eps, inv_hidden,
                     valid_hidden):
    x = x_ref[...].astype(jnp.float32)            # (tile_rows, hidden_p), f32
    g = gamma_ref[...]                            # (1, hidden_p), f32
    b = beta_ref[...]                             # (1, hidden_p), f32

    hidden_p = x.shape[-1]

    # Mean over the true hidden size. Padded lanes hold zeros, so the plain
    # lane-sum is already correct; reciprocal-multiply instead of divide.
    u = jnp.sum(x, axis=-1, keepdims=True) * inv_hidden   # XLU + VPU
    d = x - u

    # Padded lanes would contribute u^2 to the variance; mask them out.
    if valid_hidden != hidden_p:
        lane = jax.lax.broadcasted_iota(jnp.int32, (1, hidden_p), 1)
        d = jnp.where(lane < valid_hidden, d, 0.0)

    s = jnp.sum(d * d, axis=-1, keepdims=True) * inv_hidden
    inv = jax.lax.rsqrt(s + eps)                  # EUP

    # PyTorch association order: gamma * ((x - u) / sqrt(var + eps)) + beta.
    o_ref[...] = ((d * inv) * g + b).astype(o_ref.dtype)


def _round_up(v, m):
    return ((v + m - 1) // m) * m


def _tpu_gen_config():
    """Per-generation (target input bytes / buffer, vmem_limit, #TensorCores)."""
    kind = ""
    try:
        kind = jax.devices()[0].device_kind.lower()
    except Exception:
        pass
    vmem_phys = None
    try:
        vmem_phys = int(pltpu.get_tpu_info().vmem_capacity_bytes)
    except Exception:
        pass

    small_vmem = vmem_phys is not None and vmem_phys <= 80 * (1 << 20)
    if "v7" in kind or small_vmem:
        # v7x: ~3.2 TB/s per TC, 64 MiB physical VMEM, 2 TCs per chip.
        return {"target_bytes": 5 << 20, "vmem_limit": 56 << 20, "num_tc": 2}
    if "v5" in kind:
        # v5e: ~820 GB/s, 128 MiB VMEM (default scoped limit is only 16 MiB,
        # so the explicit raise below is required), 1 TC.
        return {"target_bytes": 2 << 20, "vmem_limit": 96 << 20, "num_tc": 1}
    if "v6" in kind:
        # v6e: ~1.35 TB/s, 128 MiB VMEM, 1 TC.
        return {"target_bytes": 4 << 20, "vmem_limit": 96 << 20, "num_tc": 1}
    # Unknown generation: conservative numbers that fit every chip.
    return {"target_bytes": 2 << 20, "vmem_limit": 48 << 20, "num_tc": 1}


def _choose_tile_rows(rows, hidden_p, in_dtype, out_dtype, cfg):
    """Row tile: multiple of the packed sublane tile, sized from the
    per-generation bandwidth target AND the full f32 working-set budget,
    capped so the grid has >= 2 steps per TensorCore."""
    in_item = jnp.dtype(in_dtype).itemsize
    out_item = jnp.dtype(out_dtype).itemsize
    packing = 8 * max(1, 4 // in_item)            # 8 f32, 16 bf16, 32 int8

    # (a) Amortize the ~0.35 us per-grid-step overhead.
    tile = cfg["target_bytes"] // max(1, hidden_p * in_item)

    # (b) Full working-set accounting: double-buffered input + output plus
    #     roughly 3 full-tile f32 temporaries (x_f32 / d / product).
    per_row_bytes = hidden_p * (2 * in_item + 2 * out_item + 3 * 4)
    budget = int(cfg["vmem_limit"] * 0.75)
    tile = min(tile, budget // max(1, per_row_bytes))

    # (c) Keep >= 2 grid steps per TensorCore when the problem allows it.
    min_steps = 2 * cfg["num_tc"]
    if rows > packing:
        cap = max(packing, _round_up(-(-rows // min_steps), packing))
        tile = min(tile, cap)

    tile = min(tile, 8192)
    tile = max(packing, (tile // packing) * packing)
    tile = min(tile, _round_up(rows, packing))
    return max(packing, tile)


def layer_norm(x, gamma, beta, variance_epsilon=1e-12, tile_rows=None):
    """x: [..., hidden] -> LayerNorm over the last dim; gamma/beta: [hidden]."""
    orig_shape = x.shape
    hidden = orig_shape[-1]
    rows = 1
    for d in orig_shape[:-1]:
        rows *= d
    x2 = x.reshape(rows, hidden)

    cfg = _tpu_gen_config()

    # Lane-dense stores: pad the hidden (lane) axis to a multiple of 128.
    hidden_p = max(128, _round_up(hidden, 128))

    # One-time cast of the (tiny) params; avoids per-tile casts in the kernel.
    gamma2 = gamma.reshape(1, hidden).astype(jnp.float32)
    beta2 = beta.reshape(1, hidden).astype(jnp.float32)
    if hidden_p != hidden:
        pad = hidden_p - hidden
        x2 = jnp.pad(x2, ((0, 0), (0, pad)))
        gamma2 = jnp.pad(gamma2, ((0, 0), (0, pad)))
        beta2 = jnp.pad(beta2, ((0, 0), (0, pad)))

    if tile_rows is None:
        tile_rows = _choose_tile_rows(rows, hidden_p, x.dtype, x.dtype, cfg)

    # No host-side row padding: the partial last block is masked on writeback
    # by Pallas; LayerNorm is strictly row-independent so garbage rows in the
    # last tile never contaminate valid rows.
    grid = (pl.cdiv(rows, tile_rows),)

    kernel = functools.partial(
        layernorm_kernel,
        eps=float(variance_epsilon),
        inv_hidden=1.0 / hidden,
        valid_hidden=hidden,
    )

    out = pl.pallas_call(
        kernel,
        out_shape=jax.ShapeDtypeStruct((rows, hidden_p), x.dtype),
        grid_spec=pltpu.PrefetchScalarGridSpec(
            num_scalar_prefetch=0,
            grid=grid,
            in_specs=[
                pl.BlockSpec((tile_rows, hidden_p), lambda i: (i, 0)),
                pl.BlockSpec((1, hidden_p), lambda i: (0, 0)),
                pl.BlockSpec((1, hidden_p), lambda i: (0, 0)),
            ],
            out_specs=pl.BlockSpec((tile_rows, hidden_p), lambda i: (i, 0)),
        ),
        compiler_params=pltpu.CompilerParams(
            dimension_semantics=("parallel",),      # shards rows across TCs
            vmem_limit_bytes=cfg["vmem_limit"],
        ),
    )(x2, gamma2, beta2)

    if hidden_p != hidden:
        out = out[:, :hidden]
    return out.reshape(orig_shape)


if __name__ == "__main__":
    batch, seq, hidden = 2, 8, 32
    key = jax.random.PRNGKey(0)
    x = jax.random.normal(key, (batch, seq, hidden), dtype=jnp.float32)

    # Deterministic parameter init matching nn.Parameter(torch.ones/zeros).
    gamma = jnp.ones((hidden,), dtype=jnp.float32)
    beta = jnp.zeros((hidden,), dtype=jnp.float32)

    y = layer_norm(x, gamma, beta, variance_epsilon=1e-12)
    y = jax.block_until_ready(y)

    # Reference check (plain JAX) to confirm semantics.
    u = jnp.mean(x, axis=-1, keepdims=True)
    s = jnp.mean((x - u) ** 2, axis=-1, keepdims=True)
    ref = gamma * ((x - u) / jnp.sqrt(s + 1e-12)) + beta
    assert jnp.allclose(y, ref, atol=1e-5, rtol=1e-5), "mismatch vs reference"

    print("KERNEL_OK")
</pallas_src>

<mosaic_0001>
module attributes {stable_mosaic.version = 11 : i64} {
  func.func @layernorm_kernel(%arg0: i32, %arg1: memref<8x128xf32, #tpu.memory_space<vmem>>, %arg2: memref<1x128xf32, #tpu.memory_space<vmem>>, %arg3: memref<1x128xf32, #tpu.memory_space<vmem>>, %arg4: memref<8x128xf32, #tpu.memory_space<vmem>>) attributes {dimension_semantics = [#tpu.dimension_semantics<parallel>], iteration_bounds = array<i64: 2>, scalar_prefetch = 0 : i64, scratch_operands = 0 : i64, tpu.core_type = #tpu.core_type<tc>, window_params = [{transform_indices = @transform_0, window_bounds = array<i64: 8, 128>}, {pipeline_mode = #tpu.pipeline_mode<synchronous>, transform_indices = @transform_1, window_bounds = array<i64: 1, 128>}, {pipeline_mode = #tpu.pipeline_mode<synchronous>, transform_indices = @transform_2, window_bounds = array<i64: 1, 128>}, {transform_indices = @transform_3, window_bounds = array<i64: 8, 128>}]} {
    %c0 = arith.constant 0 : index
    %c0_0 = arith.constant 0 : index
    %0 = vector.load %arg1[%c0, %c0_0] : memref<8x128xf32, #tpu.memory_space<vmem>>, vector<8x128xf32>
    %c0_1 = arith.constant 0 : index
    %c0_2 = arith.constant 0 : index
    %1 = vector.load %arg2[%c0_1, %c0_2] : memref<1x128xf32, #tpu.memory_space<vmem>>, vector<1x128xf32>
    %c0_3 = arith.constant 0 : index
    %c0_4 = arith.constant 0 : index
    %2 = vector.load %arg3[%c0_3, %c0_4] : memref<1x128xf32, #tpu.memory_space<vmem>>, vector<1x128xf32>
    %cst = arith.constant dense<0.000000e+00> : vector<8xf32>
    %3 = vector.multi_reduction <add>, %0, %cst [1] : vector<8x128xf32> to vector<8xf32>
    %4 = vector.shape_cast %3 : vector<8xf32> to vector<8x1xf32>
    %cst_5 = arith.constant 3.125000e-02 : f32
    %5 = vector.broadcast %cst_5 : f32 to vector<8x1xf32>
    %6 = arith.mulf %4, %5 : vector<8x1xf32>
    %7 = vector.broadcast %6 : vector<8x1xf32> to vector<8x128xf32>
    %8 = arith.subf %0, %7 : vector<8x128xf32>
    %9 = tpu.iota {dimensions = array<i32: 1>} : vector<1x128xi32>
    %c32_i32 = arith.constant 32 : i32
    %10 = vector.broadcast %c32_i32 : i32 to vector<1x128xi32>
    %11 = arith.cmpi slt, %9, %10 : vector<1x128xi32>
    %cst_6 = arith.constant 0.000000e+00 : f32
    %12 = vector.shape_cast %11 : vector<1x128xi1> to vector<1x128xi1>
    %13 = vector.broadcast %12 : vector<1x128xi1> to vector<8x128xi1>
    %14 = vector.broadcast %cst_6 : f32 to vector<8x128xf32>
    %15 = arith.select %13, %8, %14 : vector<8x128xi1>, vector<8x128xf32>
    %16 = arith.mulf %15, %15 : vector<8x128xf32>
    %cst_7 = arith.constant dense<0.000000e+00> : vector<8xf32>
    %17 = vector.multi_reduction <add>, %16, %cst_7 [1] : vector<8x128xf32> to vector<8xf32>
    %18 = vector.shape_cast %17 : vector<8xf32> to vector<8x1xf32>
    %cst_8 = arith.constant 3.125000e-02 : f32
    %19 = vector.broadcast %cst_8 : f32 to vector<8x1xf32>
    %20 = arith.mulf %18, %19 : vector<8x1xf32>
    %cst_9 = arith.constant 9.99999996E-13 : f32
    %21 = vector.broadcast %cst_9 : f32 to vector<8x1xf32>
    %22 = arith.addf %20, %21 : vector<8x1xf32>
    %23 = math.rsqrt %22 : vector<8x1xf32>
    %24 = vector.broadcast %23 : vector<8x1xf32> to vector<8x128xf32>
    %25 = arith.mulf %15, %24 : vector<8x128xf32>
    %26 = vector.broadcast %1 : vector<1x128xf32> to vector<8x128xf32>
    %27 = arith.mulf %25, %26 : vector<8x128xf32>
    %28 = vector.broadcast %2 : vector<1x128xf32> to vector<8x128xf32>
    %29 = arith.addf %27, %28 : vector<8x128xf32>
    %c0_10 = arith.constant 0 : index
    %c0_11 = arith.constant 0 : index
    %30 = vector.load %arg4[%c0_10, %c0_11] : memref<8x128xf32, #tpu.memory_space<vmem>>, vector<8x128xf32>
    tpu.vector_store %arg4[%c0_10, %c0_11], %29 {strides = array<i32>} : memref<8x128xf32, #tpu.memory_space<vmem>>, vector<8x128xf32>,
    return
  }
  func.func @transform_0(%arg0: i32) -> (i32, i32) {
    %c0_i32 = arith.constant 0 : i32
    %c0_i32_0 = arith.constant 0 : i32
    return %arg0, %c0_i32 : i32, i32
  }
  func.func @transform_1(%arg0: i32) -> (i32, i32) {
    %c0_i32 = arith.constant 0 : i32
    %c0_i32_0 = arith.constant 0 : i32
    %c0_i32_1 = arith.constant 0 : i32
    return %c0_i32, %c0_i32_0 : i32, i32
  }
  func.func @transform_2(%arg0: i32) -> (i32, i32) {
    %c0_i32 = arith.constant 0 : i32
    %c0_i32_0 = arith.constant 0 : i32
    %c0_i32_1 = arith.constant 0 : i32
    return %c0_i32, %c0_i32_0 : i32, i32
  }
  func.func @transform_3(%arg0: i32) -> (i32, i32) {
    %c0_i32 = arith.constant 0 : i32
    %c0_i32_0 = arith.constant 0 : i32
    return %arg0, %c0_i32 : i32, i32
  }
}

</mosaic_0001>

<bundles_post_ra>
// kernel: tpu_custom_call.1
= control target key start
LH: loop header
LB: loop body
LE: loop exit
PB: predicated region body
PF: predicated region fallthrough
CT: control target
= control target key end

     0   :  { %8 = vsyncpa [#allocation3], 0  ;;  %s654_s0 = inlined_call_operand.hbm [shape: f32[16,128], index: 0, kind: input, shape index: {}]   ;;  %s655_s1 = inlined_call_operand.vmem [shape: f32[1,128], index: 1, kind: input, shape index: {}]   ;;  %s656_s2 = inlined_call_operand.vmem [shape: f32[1,128], index: 2, kind: input, shape index: {}]   ;;  %s657_s3 = inlined_call_operand.hbm [shape: f32[16,128], index: 3, kind: output, shape index: {}]  }
   0x1   :  { %10 = vsyncpa [#allocation3 + $0x1], 0 }
   0x2   :  { %11 = vsyncpa [#allocation4], 0 }
   0x3   :  { %13 = vsyncpa [#allocation4 + $0x1], 0  ;;  %s487_s12 = smov 0   ;;  %s489_s13 = smov 0  }
   0x4   :  { %s491_s14 = smov 0   ;;  %s493_s15 = smov 0  }
   0x5 LB: > { %s508_s16 = sadd.s32 4294967295, %s463_s15   ;;  %s305_s17 = sadd.s32 4294967294, %s463_s15   ;;  %s463_s15 = sphi %s493_s15, %s672_s15   ;;  %s459_s14 = sphi %s491_s14, %s671_s14   ;;  %s455_s13 = sphi %s489_s13, %s670_s13   ;;  %s451_s12 = sphi %s487_s12, %s669_s12  }
   0x6   : > { %s512_s18 = sadd.s32 1, %s463_s15   ;;  %s26_s19 = sadd.s32 1, %s459_s14 }
   0x7   : > { %s23_s20 = ssub.s32 %s463_s15, %s512_s18  ;;  %p33_p0 = scmp.ne.s32.totalorder %s459_s14, %s455_s13 }
   0x8   : > { %p24_p1 = scmp.eq.s32.totalorder %s23_s20, 0  ;;  %p34_p2 = scmp.eq.s32.totalorder %s463_s15, 0 }
   0x9   : > { %p39_p3 = scmp.ne.s32.totalorder %s455_s13, %s451_s12  ;;  %p40_p4 = scmp.eq.s32.totalorder %s508_s16, 0 }
   0xa   : > { %s524_s21 = scalar_select %p24_p1, %s459_s14, %s26_s19  }
   0xb   : > { %p526_p5 = por %p34_p2, %p33_p0  ;;  %p530_p6 = por %p40_p4, %p39_p3 }
   0xc   : > { %p105_p7 = scmp.eq.s32.totalorder %s508_s16, 1  ;;  %p111_p8 = scmp.eq.s32.totalorder %s305_s17, 1 }
   0xd   : > { %p331_p10 = scmp.lt.s32.totalorder %s463_s15, 2  ;;  %s137_s26 = sand.u32 1, %s459_s14  }
   0xe   : > { %p537_p11 = por %p105_p7, %p33_p0  ;;  %p541_p12 = por %p111_p8, %p39_p3 }
   0xf   : > { %s309_s27 = sshll.u32 %s463_s15, 7  ;;  %s308_s28 = sshll.u32 %s137_s26, 3 }
  0x10   : > { %s661_s24 = scalar_select %p537_p11, 1, 0 }
  0x11   : > { %s662_s25 = scalar_select %p541_p12, 1, 0 }
  0x12   : > { %s550_s4 = scalar_lea.hbm %s654_s0, %s309_s27  ;;  %s141_s5 = scalar_lea.vmem [#allocation2], %s308_s28 }
  0x13   : > { %s148_s6 = sshll.u32 %s141_s5, 4  ;;  %p554_p13 = pnand %p331_p10, %p526_p5  ;;  %s558_s6 = int_to_ptr.vmem [resolvable:$true] %s148_s6 }
  0x14   : > { %s138_s8 = scalar_lea.sflag [#allocation3], %s137_s26  ;;  %s367_s9 = scalar_lea.hbm %s550_s4, 128 }
  0x15   : > { %p368_p2 = scmp.ne.s32.totalorder %s550_s4, %s367_s9  ;;  %p369_p3 = pneg %p554_p13 }
  0x16   : > { %s372_s17 = scalar_lea.hbm %s654_s0, 256  ;;  %p373_p5 = scmp.lt.u32.totalorder %s550_s4, %s654_s0 }
  0x17   : > { %p370_p4 = pnand %p369_p3, %p368_p2  ;;  %p374_p8 = scmp.lt.u32.totalorder %s372_s17, %s367_s9 }
  0x18   : > { %p376_p9 = scmp.lt.u32.totalorder %s367_s9, %s550_s4 }
  0x19   : > { %p371_p7 = pneg %p370_p4  ;;  %p375_p10 = por %p374_p8, %p373_p5 }
  0x1b   : > { %p377_p0 = por %p376_p9, %p375_p10 }
  0x1d   : > { %p378_p1 = pnand %p377_p0, %p371_p7 }
  0x1f   : > { %381 = shalt.err (!%p378_p1)
}
  0x20   : > { %s382_s22 = scalar_lea.vmem %s558_s6, 128  ;;  %s465_s26 = smov [#allocation2]  }
  0x21   : > { %p383_p2 = scmp.ne.s32.totalorder %s558_s6, %s382_s22  ;;  %s387_s27 = sshll.u32 %s465_s26, 4  ;;  %s388_s27 = int_to_ptr.vmem [resolvable:$false] %s387_s27 }
  0x22   : > { %s389_s28 = scalar_lea.vmem %s388_s27, 256  ;;  %p390_p11 = scmp.lt.s32.totalorder %s558_s6, %s388_s27 }
  0x23   : > { %p385_p4 = pnand %p383_p2, %p369_p3  ;;  %p391_p5 = scmp.lt.s32.totalorder %s389_s28, %s382_s22 }
  0x25   : > { %p386_p12 = pneg %p385_p4  ;;  %p392_p8 = por %p391_p5, %p390_p11 }
  0x27   : > { %p393_p9 = pnand %p392_p8, %p386_p12 }
  0x29   : > { %396 = shalt.err (!%p393_p9)
}
  0x2a   : > { %326 = dma.hbm_to_vmem [thread:$0]  (!%p554_p13), %s550_s4, 128, %s558_s6, %s138_s8  }
  0x2b   : > { %p664_p0 = scmp.lt.s32.totalorder %s463_s15, 3  ;;  %p665_p1 = scmp.ge.s32.totalorder %s463_s15, 1 }
  0x2d   : > { %p154_p3 = pnand %p665_p1, %p664_p0 }
  0x2e   : > { %s592_s29 = sand.u32 (!%p154_p3), 1, %s455_s13  }
  0x2f   : > { %157 = sbr.rel (%p154_p3) target bundleno = 382 (0x17e), region = 32  ;;  %s311_s30 = sshll.u32 (!%p154_p3), %s592_s29, 3 }
  0x30   : > { %s160_s5 = scalar_lea.sflag (!%p154_p3), [#allocation3], %s592_s29  ;;  %s163_s9 = scalar_lea.vmem (!%p154_p3), [#allocation2], %s311_s30 }
  0x36   : > { %442 = dma.done.wait (%p530_p6), %s160_s5, 128  }
  0x37   : > { %444 = vsyncadd (%p530_p6), %s160_s5, 4294967168  ;;  %v186_v0 = vld [vmem:[%s163_s9] sm:$0xff]  ;;  %v193_v1 = vlaneseq  ;;  %s316_s8 = sshll.u32 %s508_s16, 7  ;;  %s185_s10 = scalar_lea.vmem [#allocation5], %s311_s30 }
  0x38   : > { %189 = vadd.xlane.f32.xlu0 %v186_v0  ;;  %v313_v12 = vld [vmem:[%s655_s1] ss:$0 sm:$0xff]  ;;  %s235_s11 = sshll.u32 %s185_s10, 4  ;;  %s610_s20 = scalar_lea.hbm %s657_s3, %s316_s8  ;;  %s612_s11 = int_to_ptr.vmem [resolvable:$true] %s235_s11 }
  0x39   : > { %v194_v2 = vand.u32 127, %v193_v1  ;;  %v314_v14 = vld [vmem:[%s656_s2] ss:$0 sm:$0xff]  ;;  %s222_s22 = scalar_lea.sflag [#allocation4], %s592_s29  ;;  %s397_s26 = scalar_lea.vmem %s612_s11, 128 }
  0x3a   : > { %p398_p6 = scmp.ne.s32.totalorder %s612_s11, %s397_s26  ;;  %p666_p11 = scmp.ne.s32.totalorder %s661_s24, 0 }
  0x3b   : > { %vm195_vm0 = vcmp.lt.s32.totalorder %v194_v2, 32  ;;  %s466_s16 = smov [#allocation5]  }
  0x3c   : > { %p399_p12 = pnand %p398_p6, %p666_p11  ;;  %s401_s27 = sshll.u32 %s466_s16, 4  ;;  %s402_s27 = int_to_ptr.vmem [resolvable:$false] %s401_s27 }
  0x3d   : > { %s403_s28 = scalar_lea.vmem %s402_s27, 256  ;;  %p404_p7 = scmp.lt.s32.totalorder %s612_s11, %s402_s27 }
  0x3e   : > { %p400_p13 = pneg %p399_p12  ;;  %p405_p10 = scmp.lt.s32.totalorder %s403_s28, %s397_s26 }
  0x40   : > { %p406_p2 = por %p405_p10, %p404_p7 }
  0x42   : > { %p407_p4 = pnand %p406_p2, %p400_p13 }
  0xc5   : > { %v190_v3 = vpop.xlane.xlu0 %189 }
  0xc6   : > { %v191_v4 = vmul.f32 0.03125, %v190_v3 }
  0xc8   : > { %v192_v5 = vsub.f32 %v186_v0, %v191_v4 }
  0xca   : > { %v198_v6 = vsel %vm195_vm0, %v192_v5, 0.0 }
  0xcb   : > { %v199_v7 = vmul.f32 %v198_v6, %v198_v6 }
  0xcd   : > { %200 = vadd.xlane.f32.xlu0 %v199_v7 }
 0x15a   : > { %v201_v8 = vpop.xlane.xlu0 %200 }
 0x15b   : > { %v202_v9 = vmul.f32 0.03125, %v201_v8 }
 0x15d   : > { %v203_v10 = vadd.f32 1e-12, %v202_v9 }
 0x15f   : > { %365 = vrsqrt.f32 %v203_v10 }
 0x169   : > { %v366_v11 = vpop.eup %365 }
 0x16a   : > { %v205_v13 = vmul.f32 %v366_v11, %v198_v6 }
 0x16c   : > { %v212_v15 = vmul.f32 %v313_v12, %v205_v13 }
 0x16e   : > { %v219_v16 = vadd.f32 %v314_v14, %v212_v15 }
 0x170   : > { %220 = vst [vmem:[%s185_s10] sm:$0xff] %v219_v16 }
 0x171   : > { %410 = shalt.err (!%p407_p4)
}
 0x172   : > { %s411_s29 = scalar_lea.hbm %s610_s20, 128  ;;  %s415_s9 = scalar_lea.hbm %s657_s3, 256 }
 0x173   : > { %p412_p5 = scmp.ne.s32.totalorder %s610_s20, %s411_s29  ;;  %p416_p0 = scmp.lt.u32.totalorder %s610_s20, %s657_s3 }
 0x174   : > { %p417_p1 = scmp.lt.u32.totalorder %s415_s9, %s411_s29  ;;  %p419_p6 = scmp.lt.u32.totalorder %s411_s29, %s610_s20 }
 0x175   : > { %p413_p8 = pnand %p412_p5, %p666_p11 }
 0x176   : > { %p418_p3 = por %p417_p1, %p416_p0 }
 0x177   : > { %p414_p9 = pneg %p413_p8 }
 0x178   : > { %p420_p12 = por %p419_p6, %p418_p3 }
 0x17a   : > { %p421_p13 = pnand %p420_p12, %p414_p9 }
 0x17c   : > { %424 = shalt.err (!%p421_p13)
}
 0x17d   : > { %321 = dma.vmem_to_hbm [thread:$0]  (%p666_p11), %s612_s11, 128, %s610_s20, %s222_s22  }
 0x17e PF: > { %s247_s6 = sand.u32 1, %s451_s12   ;;  %p667_p7 = scmp.ne.s32.totalorder %s662_s25, 0 }
 0x17f   : > { %p668_p10 = scmp.ge.s32.totalorder %s463_s15, 2  ;;  %s248_s7 = scalar_lea.sflag [#allocation4], %s247_s6 }
 0x181   : > { %p328_p2 = pnand %p668_p10, %p667_p7 }
 0x183   : > { %446 = dma.done.wait (!%p328_p2), %s248_s7, 128  }
 0x184   : > { %448 = vsyncadd (!%p328_p2), %s248_s7, 4294967168  ;;  %p16_p4 = scmp.ge.s32.totalorder %s512_s18, 4   ;;  %s669_s12 = smov %s455_s13 }
 0x185   : > { %s670_s13 = smov %s459_s14  ;;  %s671_s14 = smov %s524_s21 }
 0x186   : > { %s672_s15 = smov %s512_s18  ;;  %18 = sbr.rel (!%p16_p4) target bundleno = 5 (0x5), region = 77 }
 0x18d   :  { %253 = vsyncpa [#allocation3], 1 }
 0x18e   :  { %255 = vsyncpa [#allocation3 + $0x1], 1 }
 0x18f   :  { %256 = vsyncpa [#allocation4], 1 }
 0x190   :  { %258 = vsyncpa [#allocation4 + $0x1], 1 }

</bundles_post_ra>
